<compile_context>
chip_gen: v6e
topology: v6e:2x2x1
jax: 0.10.0
libtpu: 0.0.40
codegen_flags: <defaults>
</compile_context>

<pallas_src>
import functools

import jax
import jax.numpy as jnp
from jax.experimental import pallas as pl
from jax.experimental.pallas import tpu as pltpu


_LANE = 128
# Per-block footprint target (native dtype). Large enough that the tiled-add
# roofline regime (~512+ lane tiles) is reached, small enough that
# 2 (in/out) x 2 (double-buffer) blocks + f32 temporaries stay far below
# v7x's 64 MiB VMEM.
_TARGET_BLOCK_BYTES = 4 * 1024 * 1024


def _layernorm_kernel(eps, inv_c, x_ref, g_ref, b_ref, o_ref):
    # x_ref block: (BT, C, TL); g_ref / b_ref: (C, 1) (full arrays, resident).
    xf = x_ref[...].astype(jnp.float32)                       # (BT, C, TL)
    # Single-pass moments over the channel (sublane) axis, f32 accumulation.
    s1 = jnp.sum(xf, axis=1, keepdims=True)                   # (BT, 1, TL)
    s2 = jnp.sum(xf * xf, axis=1, keepdims=True)              # (BT, 1, TL)
    mean = s1 * inv_c
    var = jnp.maximum(s2 * inv_c - mean * mean, 0.0)          # unbiased=False
    inv = jax.lax.rsqrt(var + eps)                            # EUP slot (free-ish)
    g = g_ref[...].astype(jnp.float32)[None]                  # (1, C, 1)
    b = b_ref[...].astype(jnp.float32)[None]                  # (1, C, 1)
    o_ref[...] = ((xf - mean) * inv * g + b).astype(o_ref.dtype)


def _choose_tiles(B, C, L, itemsize):
    """Pick (block_b, block_l) under the per-block VMEM budget."""
    slab_bytes = C * L * itemsize
    if L < _LANE or slab_bytes <= _TARGET_BLOCK_BYTES:
        # Small / cheap L: take the full extent (exempt from the 128 rule).
        tl = L
    else:
        # Largest multiple of 128 lanes that fits the budget; a ragged tail
        # tile (if L is not a multiple) is handled by masked stores.
        tl = max(_LANE, (_TARGET_BLOCK_BYTES // (C * itemsize)) // _LANE * _LANE)
        tl = min(tl, (L // _LANE) * _LANE)
    # Batch several B rows per step when a single (C, TL) slab is tiny.
    per_b = C * tl * itemsize
    bt = max(1, min(B, _TARGET_BLOCK_BYTES // max(per_b, 1)))
    while B % bt:  # keep leading-dim blocks exact (no partial batch tiles)
        bt -= 1
    return bt, tl


def layer_norm(x, g, b, eps=1e-5, *, block_b=None, block_l=None):
    """x: (B, C, L); g, b: (1, C, 1) / (C, 1) / (C,). Returns (B, C, L)."""
    B, C, L = x.shape
    g2 = jnp.reshape(g, (C, 1))
    b2 = jnp.reshape(b, (C, 1))

    itemsize = jnp.dtype(x.dtype).itemsize
    auto_bt, auto_tl = _choose_tiles(B, C, L, itemsize)
    bt = auto_bt if block_b is None else block_b
    tl = auto_tl if block_l is None else block_l

    grid = (pl.cdiv(B, bt), pl.cdiv(L, tl))

    # Rough VMEM estimate: double-buffered in + out tiles, f32 temporaries,
    # and the tiny (C, 1) params. Raise the scoped limit above the 16/32 MiB
    # defaults but stay well under v7x's 64 MiB physical VMEM.
    blk = bt * C * tl
    est = 2 * 2 * blk * itemsize + 3 * blk * 4 + 4 * C * 4
    vmem_limit = int(min(max(2 * est, 32 * 1024 * 1024), 48 * 1024 * 1024))

    kernel = functools.partial(_layernorm_kernel, float(eps), 1.0 / C)

    return pl.pallas_call(
        kernel,
        out_shape=jax.ShapeDtypeStruct((B, C, L), x.dtype),
        grid_spec=pltpu.PrefetchScalarGridSpec(
            num_scalar_prefetch=0,
            grid=grid,
            in_specs=[
                pl.BlockSpec((bt, C, tl), lambda i, j: (i, 0, j)),
                pl.BlockSpec((C, 1), lambda i, j: (0, 0)),  # constant -> DMA once
                pl.BlockSpec((C, 1), lambda i, j: (0, 0)),
            ],
            out_specs=pl.BlockSpec((bt, C, tl), lambda i, j: (i, 0, j)),
        ),
        compiler_params=pltpu.CompilerParams(
            dimension_semantics=("parallel", "parallel"),
            vmem_limit_bytes=vmem_limit,
        ),
    )(x, g2, b2)


def layer_norm_ref(x, g, b, eps=1e-5):
    # Pure-JAX reference mirroring the PyTorch forward (unbiased=False).
    xf = x.astype(jnp.float32)
    mean = jnp.mean(xf, axis=1, keepdims=True)
    var = jnp.mean((xf - mean) ** 2, axis=1, keepdims=True)
    gr = jnp.reshape(g, (1, x.shape[1], 1))
    br = jnp.reshape(b, (1, x.shape[1], 1))
    return ((xf - mean) / jnp.sqrt(var + eps) * gr + br).astype(x.dtype)


if __name__ == "__main__":
    key = jax.random.PRNGKey(0)
    eps = 1e-5

    # Case 1: module-like small shape; params exactly as in __init__ (1, dim, 1).
    B, C, L = 2, 32, 16
    k1, k2 = jax.random.split(key)
    x = jax.random.normal(k1, (B, C, L), dtype=jnp.float32)
    g = jnp.ones((1, C, 1), dtype=jnp.float32)
    b = jnp.zeros((1, C, 1), dtype=jnp.float32)
    out = jax.block_until_ready(layer_norm(x, g, b, eps=eps))
    ref = layer_norm_ref(x, g, b, eps=eps)
    assert out.shape == (B, C, L)
    assert jnp.allclose(out, ref, atol=1e-4, rtol=1e-4), "case 1 mismatch"

    # Case 2: exercise lane tiling (L multiple of 128, forced 128-lane blocks,
    # 2 batch rows per step) with non-trivial affine params.
    B2, C2, L2 = 4, 64, 256
    kx, kg, kb = jax.random.split(k2, 3)
    x2 = jax.random.normal(kx, (B2, C2, L2), dtype=jnp.float32)
    g2 = 1.0 + 0.1 * jax.random.normal(kg, (1, C2, 1), dtype=jnp.float32)
    b2 = 0.1 * jax.random.normal(kb, (1, C2, 1), dtype=jnp.float32)
    out2 = jax.block_until_ready(
        layer_norm(x2, g2, b2, eps=eps, block_b=2, block_l=128))
    ref2 = layer_norm_ref(x2, g2, b2, eps=eps)
    assert jnp.allclose(out2, ref2, atol=1e-4, rtol=1e-4), "case 2 mismatch"

    # Case 3: L not a multiple of the lane tile -> masked tail stores.
    B3, C3, L3 = 2, 16, 192
    x3 = jax.random.normal(jax.random.PRNGKey(3), (B3, C3, L3), dtype=jnp.float32)
    g3 = jnp.ones((1, C3, 1), dtype=jnp.float32)
    b3 = jnp.zeros((1, C3, 1), dtype=jnp.float32)
    out3 = jax.block_until_ready(layer_norm(x3, g3, b3, eps=eps, block_l=128))
    ref3 = layer_norm_ref(x3, g3, b3, eps=eps)
    assert jnp.allclose(out3, ref3, atol=1e-4, rtol=1e-4), "case 3 mismatch"

    print("KERNEL_OK")
</pallas_src>

<mosaic_0001>
module attributes {stable_mosaic.version = 11 : i64} {
  func.func @_layernorm_kernel(%arg0: i32, %arg1: i32, %arg2: memref<2x32x16xf32, #tpu.memory_space<vmem>>, %arg3: memref<32x1xf32, #tpu.memory_space<vmem>>, %arg4: memref<32x1xf32, #tpu.memory_space<vmem>>, %arg5: memref<2x32x16xf32, #tpu.memory_space<vmem>>) attributes {dimension_semantics = [#tpu.dimension_semantics<parallel>, #tpu.dimension_semantics<parallel>], iteration_bounds = array<i64: 1, 1>, scalar_prefetch = 0 : i64, scratch_operands = 0 : i64, tpu.core_type = #tpu.core_type<tc>, window_params = [{transform_indices = @transform_0, window_bounds = array<i64: 2, 32, 16>}, {pipeline_mode = #tpu.pipeline_mode<synchronous>, transform_indices = @transform_1, window_bounds = array<i64: 32, 1>}, {pipeline_mode = #tpu.pipeline_mode<synchronous>, transform_indices = @transform_2, window_bounds = array<i64: 32, 1>}, {transform_indices = @transform_3, window_bounds = array<i64: 2, 32, 16>}]} {
    %c0 = arith.constant 0 : index
    %c0_0 = arith.constant 0 : index
    %c0_1 = arith.constant 0 : index
    %0 = vector.load %arg2[%c0, %c0_0, %c0_1] : memref<2x32x16xf32, #tpu.memory_space<vmem>>, vector<2x32x16xf32>
    %cst = arith.constant dense<0.000000e+00> : vector<2x16xf32>
    %1 = vector.multi_reduction <add>, %0, %cst [1] : vector<2x32x16xf32> to vector<2x16xf32>
    %2 = vector.shape_cast %1 : vector<2x16xf32> to vector<2x1x16xf32>
    %3 = arith.mulf %0, %0 : vector<2x32x16xf32>
    %cst_2 = arith.constant dense<0.000000e+00> : vector<2x16xf32>
    %4 = vector.multi_reduction <add>, %3, %cst_2 [1] : vector<2x32x16xf32> to vector<2x16xf32>
    %5 = vector.shape_cast %4 : vector<2x16xf32> to vector<2x1x16xf32>
    %cst_3 = arith.constant 3.125000e-02 : f32
    %6 = vector.broadcast %cst_3 : f32 to vector<2x1x16xf32>
    %7 = arith.mulf %2, %6 : vector<2x1x16xf32>
    %cst_4 = arith.constant 3.125000e-02 : f32
    %8 = vector.broadcast %cst_4 : f32 to vector<2x1x16xf32>
    %9 = arith.mulf %5, %8 : vector<2x1x16xf32>
    %10 = arith.mulf %7, %7 : vector<2x1x16xf32>
    %11 = arith.subf %9, %10 : vector<2x1x16xf32>
    %cst_5 = arith.constant 0.000000e+00 : f32
    %12 = vector.broadcast %cst_5 : f32 to vector<2x1x16xf32>
    %13 = arith.maximumf %11, %12 : vector<2x1x16xf32>
    %cst_6 = arith.constant 9.99999974E-6 : f32
    %14 = vector.broadcast %cst_6 : f32 to vector<2x1x16xf32>
    %15 = arith.addf %13, %14 : vector<2x1x16xf32>
    %16 = math.rsqrt %15 : vector<2x1x16xf32>
    %c0_7 = arith.constant 0 : index
    %c0_8 = arith.constant 0 : index
    %17 = vector.load %arg3[%c0_7, %c0_8] : memref<32x1xf32, #tpu.memory_space<vmem>>, vector<32x1xf32>
    %18 = vector.shape_cast %17 : vector<32x1xf32> to vector<1x32x1xf32>
    %c0_9 = arith.constant 0 : index
    %c0_10 = arith.constant 0 : index
    %19 = vector.load %arg4[%c0_9, %c0_10] : memref<32x1xf32, #tpu.memory_space<vmem>>, vector<32x1xf32>
    %20 = vector.shape_cast %19 : vector<32x1xf32> to vector<1x32x1xf32>
    %21 = vector.broadcast %7 : vector<2x1x16xf32> to vector<2x32x16xf32>
    %22 = arith.subf %0, %21 : vector<2x32x16xf32>
    %23 = vector.broadcast %16 : vector<2x1x16xf32> to vector<2x32x16xf32>
    %24 = arith.mulf %22, %23 : vector<2x32x16xf32>
    %25 = vector.broadcast %18 : vector<1x32x1xf32> to vector<2x32x16xf32>
    %26 = arith.mulf %24, %25 : vector<2x32x16xf32>
    %27 = vector.broadcast %20 : vector<1x32x1xf32> to vector<2x32x16xf32>
    %28 = arith.addf %26, %27 : vector<2x32x16xf32>
    %c0_11 = arith.constant 0 : index
    %c0_12 = arith.constant 0 : index
    %c0_13 = arith.constant 0 : index
    %29 = vector.load %arg5[%c0_11, %c0_12, %c0_13] : memref<2x32x16xf32, #tpu.memory_space<vmem>>, vector<2x32x16xf32>
    tpu.vector_store %arg5[%c0_11, %c0_12, %c0_13], %28 {strides = array<i32>} : memref<2x32x16xf32, #tpu.memory_space<vmem>>, vector<2x32x16xf32>,
    return
  }
  func.func @transform_0(%arg0: i32, %arg1: i32) -> (i32, i32, i32) {
    %c0_i32 = arith.constant 0 : i32
    %c0_i32_0 = arith.constant 0 : i32
    return %arg0, %c0_i32, %arg1 : i32, i32, i32
  }
  func.func @transform_1(%arg0: i32, %arg1: i32) -> (i32, i32) {
    %c0_i32 = arith.constant 0 : i32
    %c0_i32_0 = arith.constant 0 : i32
    %c0_i32_1 = arith.constant 0 : i32
    return %c0_i32, %c0_i32_0 : i32, i32
  }
  func.func @transform_2(%arg0: i32, %arg1: i32) -> (i32, i32) {
    %c0_i32 = arith.constant 0 : i32
    %c0_i32_0 = arith.constant 0 : i32
    %c0_i32_1 = arith.constant 0 : i32
    return %c0_i32, %c0_i32_0 : i32, i32
  }
  func.func @transform_3(%arg0: i32, %arg1: i32) -> (i32, i32, i32) {
    %c0_i32 = arith.constant 0 : i32
    %c0_i32_0 = arith.constant 0 : i32
    return %arg0, %c0_i32, %arg1 : i32, i32, i32
  }
}

</mosaic_0001>

<bundles_post_ra>
// kernel: tpu_custom_call.1
= control target key start
LH: loop header
LB: loop body
LE: loop exit
PB: predicated region body
PF: predicated region fallthrough
CT: control target
= control target key end

     0   :  { %v196_v0 = vmov 0   ;;  %vm22_vm0 = vcmask 130048   ;;  %s361_s1 = inlined_call_operand.vmem [shape: f32[32,1], index: 1, kind: input, shape index: {}]   ;;  %s362_s2 = inlined_call_operand.vmem [shape: f32[32,1], index: 2, kind: input, shape index: {}]   ;;  %s363_s0 = inlined_call_operand.vmem [shape: f32[2,32,16], index: 0, kind: input, shape index: {}]   ;;  %s364_s3 = inlined_call_operand.vmem [shape: f32[2,32,16], index: 3, kind: output, shape index: {}]  }
   0x1   :  { %191 = vset.pattern.permute.xlu1 %v196_v0  ;;  %190 = vset.pattern.permute.xlu0 %v196_v0  ;;  %v99_v1 = vld [vmem:[%s361_s1 + $0x10] sm:$0xff]  ;;  %v97_v2 = vld [vmem:[%s361_s1] sm:$0xff]  ;;  %v100_v3 = vld [vmem:[%s361_s1 + $0x18] sm:$0xff] }
   0x2   :  { %133 = vperm.xlu1 %191, %v99_v1   ;;  %123 = vperm.xlu0 %190, %v97_v2   ;;  %v98_v4 = vld [vmem:[%s361_s1 + $0x8] sm:$0xff]  ;;  %v101_v6 = vld [vmem:[%s362_s2] sm:$0xff]  ;;  %v104_v7 = vld [vmem:[%s362_s2 + $0x18] sm:$0xff] }
   0x3   :  { %v102_v5 = vld [vmem:[%s362_s2 + $0x8] sm:$0xff]  ;;  %v103_v8 = vld [vmem:[%s362_s2 + $0x10] sm:$0xff]  ;;  %v244_v9 = vld [vmem:[%s363_s0] sm:$0xff] }
   0x4   :  { %v249_v10 = vld [vmem:[%s363_s0 + $0x8] sm:$0xff]  ;;  %v254_v11 = vld [vmem:[%s363_s0 + $0x20] sm:$0xff]  ;;  %v264_v13 = vld [vmem:[%s363_s0 + $0x10] sm:$0xff]  ;;  %v23_v14 = vsel %vm22_vm0, %v244_v9, 0.0  ;;  %v49_v16 = vmul.f32 %v244_v9, %v244_v9 }
   0x5   :  { %v259_v12 = vld [vmem:[%s363_s0 + $0x28] sm:$0xff]  ;;  %v24_v15 = vsel %vm22_vm0, %v249_v10, 0.0  ;;  %v50_v17 = vmul.f32 %v249_v10, %v249_v10  ;;  %v36_v18 = vsel %vm22_vm0, %v254_v11, 0.0  ;;  %v53_v20 = vmul.f32 %v254_v11, %v254_v11  ;;  %v285_v22 = vld [vmem:[%s363_s0 + $0x30] sm:$0xff]  ;;  %v292_v25 = vld [vmem:[%s363_s0 + $0x18] sm:$0xff] }
   0x6   :  { %138 = vperm.xlu1 %191, %v100_v3   ;;  %128 = vperm.xlu0 %190, %v98_v4   ;;  %v37_v19 = vsel %vm22_vm0, %v259_v12, 0.0  ;;  %v54_v21 = vmul.f32 %v259_v12, %v259_v12  ;;  %v25_v23 = vadd.f32 %v24_v15, %v23_v14  ;;  %v26_v24 = vsel %vm22_vm0, %v264_v13, 0.0  ;;  %v307_v34 = vld [vmem:[%s363_s0 + $0x38] sm:$0xff] }
   0x7   :  { %v38_v26 = vadd.f32 %v37_v19, %v36_v18  ;;  %v51_v27 = vmul.f32 %v264_v13, %v264_v13  ;;  %v57_v28 = vsel %vm22_vm0, %v49_v16, 0.0  ;;  %v58_v29 = vsel %vm22_vm0, %v50_v17, 0.0 }
   0x8   :  { %v39_v30 = vsel %vm22_vm0, %v285_v22, 0.0  ;;  %v55_v31 = vmul.f32 %v285_v22, %v285_v22  ;;  %v70_v32 = vsel %vm22_vm0, %v53_v20, 0.0  ;;  %v71_v33 = vsel %vm22_vm0, %v54_v21, 0.0 }
   0x9   :  { %v27_v35 = vadd.f32 %v26_v24, %v25_v23  ;;  %v28_v36 = vsel %vm22_vm0, %v292_v25, 0.0  ;;  %v59_v37 = vadd.f32 %v58_v29, %v57_v28  ;;  %v40_v38 = vadd.f32 %v39_v30, %v38_v26 }
   0xa   :  { %156 = vperm.xlu1 %191, %v102_v5   ;;  %151 = vperm.xlu0 %190, %v101_v6   ;;  %v52_v39 = vmul.f32 %v292_v25, %v292_v25  ;;  %v60_v40 = vsel %vm22_vm0, %v51_v27, 0.0  ;;  %v72_v41 = vadd.f32 %v71_v33, %v70_v32  ;;  %v41_v42 = vsel %vm22_vm0, %v307_v34, 0.0 }
   0xb   :  { %v56_v43 = vmul.f32 %v307_v34, %v307_v34  ;;  %v73_v44 = vsel %vm22_vm0, %v55_v31, 0.0  ;;  %v29_v45 = vadd.f32 %v28_v36, %v27_v35  ;;  %v61_v46 = vadd.f32 %v60_v40, %v59_v37 }
   0xc   :  { %v42_v47 = vadd.f32 %v41_v42, %v40_v38  ;;  %v62_v48 = vsel %vm22_vm0, %v52_v39, 0.0  ;;  %v74_v49 = vadd.f32 %v73_v44, %v72_v41 }
   0xd   :  { %v75_v50 = vsel %vm22_vm0, %v56_v43, 0.0  ;;  %v30_v51 = vrot.slane %v29_v45, 4  ;;  %v63_v52 = vadd.f32 %v62_v48, %v61_v46 }
   0xe   :  { %166 = vperm.xlu1 %191, %v104_v7   ;;  %161 = vperm.xlu0 %190, %v103_v8   ;;  %v43_v53 = vrot.slane %v42_v47, 4  ;;  %v76_v54 = vadd.f32 %v75_v50, %v74_v49 }
   0xf   :  { %v31_v55 = vadd.f32 %v30_v51, %v29_v45  ;;  %v64_v56 = vrot.slane %v63_v52, 4 }
  0x10   :  { %v44_v57 = vadd.f32 %v43_v53, %v42_v47  ;;  %v77_v58 = vrot.slane %v76_v54, 4 }
  0x11   :  { %v32_v59 = vrot.slane %v31_v55, 2  ;;  %v65_v60 = vadd.f32 %v64_v56, %v63_v52 }
  0x12   :  { %v45_v61 = vrot.slane %v44_v57, 2  ;;  %v78_v62 = vadd.f32 %v77_v58, %v76_v54 }
  0x13   :  { %v33_v63 = vadd.f32 %v32_v59, %v31_v55  ;;  %v66_v0 = vrot.slane %v65_v60, 2 }
  0x14   :  { %v46_v1 = vadd.f32 %v45_v61, %v44_v57  ;;  %v79_v2 = vrot.slane %v78_v62, 2 }
  0x15   :  { %v34_v3 = vrot.slane %v33_v63, 1  ;;  %v67_v4 = vadd.f32 %v66_v0, %v65_v60 }
  0x16   :  { %v47_v5 = vrot.slane %v46_v1, 1  ;;  %v80_v6 = vadd.f32 %v79_v2, %v78_v62 }
  0x17   :  { %v35_v7 = vadd.f32 %v34_v3, %v33_v63  ;;  %v68_v8 = vrot.slane %v67_v4, 1 }
  0x18   :  { %v48_v14 = vadd.f32 %v47_v5, %v46_v1  ;;  %v81_v15 = vrot.slane %v80_v6, 1 }
  0x19   :  { %v69_v16 = vadd.f32 %v68_v8, %v67_v4  ;;  %v83_v17 = vmul.f32 0.03125, %v35_v7 }
  0x1a   :  { %v82_v18 = vadd.f32 %v81_v15, %v80_v6  ;;  %v84_v19 = vmul.f32 0.03125, %v48_v14 }
  0x1b   :  { %v85_v20 = vmul.f32 0.03125, %v69_v16  ;;  %v87_v21 = vmul.f32 %v83_v17, %v83_v17  ;;  %v105_v33 = vsub.f32 %v244_v9, %v83_v17  ;;  %v106_v36 = vsub.f32 %v249_v10, %v83_v17 }
  0x1c   :  { %v86_v23 = vmul.f32 0.03125, %v82_v18  ;;  %v88_v24 = vmul.f32 %v84_v19, %v84_v19  ;;  %v109_v35 = vsub.f32 %v254_v11, %v84_v19  ;;  %v110_v37 = vsub.f32 %v259_v12, %v84_v19 }
  0x1d   :  { %v89_v26 = vsub.f32 %v85_v20, %v87_v21  ;;  %v107_v41 = vsub.f32 %v264_v13, %v83_v17  ;;  %v111_v42 = vsub.f32 %v285_v22, %v84_v19  ;;  %v108_v43 = vsub.f32 %v292_v25, %v83_v17 }
  0x1e   :  { %v90_v27 = vsub.f32 %v86_v23, %v88_v24  ;;  %v112_v44 = vsub.f32 %v307_v34, %v84_v19 }
  0x1f   :  { %v91_v28 = vmax.f32 %v89_v26, 0.0 }
  0x20   :  { %v92_v29 = vmax.f32 %v90_v27, 0.0 }
  0x21   :  { %v93_v30 = vadd.f32 1e-05, %v91_v28 }
  0x22   :  { %v94_v31 = vadd.f32 1e-05, %v92_v29 }
  0x23   :  { %192 = vrsqrt.f32 %v93_v30 }
  0x24   :  { %194 = vrsqrt.f32 %v94_v31 }
  0x30   :  { %v193_v32 = vpop.eup %192 }
  0x31   :  { %v195_v38 = vpop.eup %194  ;;  %v113_v45 = vmul.f32 %v193_v32, %v105_v33  ;;  %v114_v9 = vmul.f32 %v193_v32, %v106_v36  ;;  %v115_v10 = vmul.f32 %v193_v32, %v107_v41  ;;  %v116_v12 = vmul.f32 %v193_v32, %v108_v43 }
  0x32   :  { %v117_v46 = vmul.f32 %v195_v38, %v109_v35  ;;  %v118_v47 = vmul.f32 %v195_v38, %v110_v37  ;;  %v119_v49 = vmul.f32 %v195_v38, %v111_v42  ;;  %v120_v50 = vmul.f32 %v195_v38, %v112_v44 }
  0x7d   :  { %v134_v39 = vpop.permute.xlu1 %133  ;;  %v124_v40 = vpop.permute.xlu0 %123 }
  0x7e   :  { %v141_v51 = vmul.f32 %v124_v40, %v113_v45  ;;  %v145_v52 = vmul.f32 %v124_v40, %v117_v46  ;;  %v143_v57 = vmul.f32 %v134_v39, %v115_v10  ;;  %v147_v58 = vmul.f32 %v134_v39, %v119_v49 }
  0x81   :  { %v139_v11 = vpop.permute.xlu1 %138  ;;  %v129_v48 = vpop.permute.xlu0 %128 }
  0x82   :  { %v142_v53 = vmul.f32 %v129_v48, %v114_v9  ;;  %v146_v13 = vmul.f32 %v129_v48, %v118_v47  ;;  %v144_v59 = vmul.f32 %v139_v11, %v116_v12  ;;  %v148_v60 = vmul.f32 %v139_v11, %v120_v50 }
  0x85   :  { %v157_v54 = vpop.permute.xlu1 %156  ;;  %v152_v22 = vpop.permute.xlu0 %151 }
  0x86   :  { %v170_v55 = vadd.f32 %v157_v54, %v142_v53  ;;  %v174_v25 = vadd.f32 %v157_v54, %v146_v13  ;;  %v169_v56 = vadd.f32 %v152_v22, %v141_v51  ;;  %v173_v34 = vadd.f32 %v152_v22, %v145_v52 }
  0x88   :  { %178 = vst.msk [vmem:[%s364_s3 + $0x8] sm:$0xff] %vm22_vm0, %v170_v55  ;;  %182 = vst.msk [vmem:[%s364_s3 + $0x28] sm:$0xff] %vm22_vm0, %v174_v25 }
  0x89   :  { %177 = vst.msk [vmem:[%s364_s3] sm:$0xff] %vm22_vm0, %v169_v56  ;;  %181 = vst.msk [vmem:[%s364_s3 + $0x20] sm:$0xff] %vm22_vm0, %v173_v34  ;;  %v167_v61 = vpop.permute.xlu1 %166  ;;  %v162_v62 = vpop.permute.xlu0 %161 }
  0x8a   :  { %v172_v63 = vadd.f32 %v167_v61, %v144_v59  ;;  %v176_v0 = vadd.f32 %v167_v61, %v148_v60  ;;  %v171_v1 = vadd.f32 %v162_v62, %v143_v57  ;;  %v175_v2 = vadd.f32 %v162_v62, %v147_v58 }
  0x8c   :  { %180 = vst.msk [vmem:[%s364_s3 + $0x18] sm:$0xff] %vm22_vm0, %v172_v63  ;;  %184 = vst.msk [vmem:[%s364_s3 + $0x38] sm:$0xff] %vm22_vm0, %v176_v0 }
  0x8d   :  { %179 = vst.msk [vmem:[%s364_s3 + $0x10] sm:$0xff] %vm22_vm0, %v171_v1  ;;  %183 = vst.msk [vmem:[%s364_s3 + $0x30] sm:$0xff] %vm22_vm0, %v175_v2 }

</bundles_post_ra>
